<compile_context>
chip_gen: v6e
topology: v6e:2x2x1
jax: 0.10.0
libtpu: 0.0.40
codegen_flags: <defaults>
</compile_context>

<pallas_src>
import functools

import jax
import jax.numpy as jnp
from jax import lax
from jax.experimental import pallas as pl
from jax.experimental.pallas import tpu as pltpu


def _round_up(x, m):
    return ((x + m - 1) // m) * m


# ---------------------------------------------------------------------------
# Kernel 1: fused per-(batch, head) Q/K/V projection + attention
# ---------------------------------------------------------------------------
def _attention_kernel(q_ref, k_ref, v_ref, wq_ref, wk_ref, wv_ref, o_ref, *,
                      scale):
    q = q_ref[0]               # (Nq,  C)
    k = k_ref[0]               # (Nkv, C)
    v = v_ref[0]               # (Nkv, C)
    wq = wq_ref[0]             # (C, D)  head slice, pre-transposed [in, out]
    wk = wk_ref[0]
    wv = wv_ref[0]

    # Head projections: native-dtype operands, f32 MXU accumulation.
    qh = jnp.dot(q, wq, preferred_element_type=jnp.float32)       # (Nq,  D)
    kh = jnp.dot(k, wk, preferred_element_type=jnp.float32)       # (Nkv, D)
    vh = jnp.dot(v, wv, preferred_element_type=jnp.float32)       # (Nkv, D)

    # scores = qh @ kh^T * scale  (contract over D, no materialized transpose)
    s = lax.dot_general(qh, kh, (((1,), (1,)), ((), ())),
                        preferred_element_type=jnp.float32) * scale  # (Nq, Nkv)

    # softmax over keys (attn_drop p=0 -> identity)
    m = jnp.max(s, axis=-1, keepdims=True)
    p = jnp.exp(s - m)
    attn = p / jnp.sum(p, axis=-1, keepdims=True)

    ctx = jnp.dot(attn, vh, preferred_element_type=jnp.float32)   # (Nq, D)
    o_ref[0, 0] = ctx.astype(o_ref.dtype)


def attention_pallas(q, k, v, wq_h, wk_h, wv_h, *, scale):
    """q: [B,Nq,C]; k,v: [B,Nkv,C]; w*_h: [H,C,D] pre-split per-head weights."""
    B, Nq, C = q.shape
    _, Nkv, _ = k.shape
    H, _, D = wq_h.shape

    kern = functools.partial(_attention_kernel, scale=scale)
    out = pl.pallas_call(
        kern,
        out_shape=jax.ShapeDtypeStruct((B, H, Nq, D), q.dtype),
        grid_spec=pltpu.PrefetchScalarGridSpec(
            num_scalar_prefetch=0,
            grid=(B, H),
            in_specs=[
                pl.BlockSpec((1, Nq, C), lambda b, h: (b, 0, 0)),
                pl.BlockSpec((1, Nkv, C), lambda b, h: (b, 0, 0)),
                pl.BlockSpec((1, Nkv, C), lambda b, h: (b, 0, 0)),
                pl.BlockSpec((1, C, D), lambda b, h: (h, 0, 0)),
                pl.BlockSpec((1, C, D), lambda b, h: (h, 0, 0)),
                pl.BlockSpec((1, C, D), lambda b, h: (h, 0, 0)),
            ],
            out_specs=pl.BlockSpec((1, 1, Nq, D), lambda b, h: (b, h, 0, 0)),
        ),
        compiler_params=pltpu.CompilerParams(
            dimension_semantics=("parallel", "parallel"),
            vmem_limit_bytes=32 * 1024 * 1024),
    )(q, k, v, wq_h, wk_h, wv_h)
    # TODO(synk): for very long Nq/Nkv replace this per-head block kernel with
    # a flash-style tiling (online softmax) over the sequence axes.
    return out   # (B, H, Nq, D)


# ---------------------------------------------------------------------------
# Kernel 2: proj + residual + LayerNorm + MLP + residual + final LayerNorm
# ---------------------------------------------------------------------------
def _layernorm_f32(x, g, b, eps):
    mu = jnp.mean(x, axis=-1, keepdims=True)
    var = jnp.mean(jnp.square(x - mu), axis=-1, keepdims=True)
    return (x - mu) * lax.rsqrt(var + eps) * g + b


def _post_block_kernel(q_ref, ctx_ref, wp_ref, bp_ref, g1_ref, be1_ref,
                       w1_ref, b1_ref, w2_ref, b2_ref, g2_ref, be2_ref,
                       o_ref, *, eps):
    x = q_ref[...].astype(jnp.float32)                    # (TM, C) residual base

    # attention output projection + residual 1 (proj_drop p=0 -> identity)
    proj = jnp.dot(ctx_ref[...], wp_ref[...],
                   preferred_element_type=jnp.float32) + bp_ref[...]
    x1 = x + proj

    # LayerNorm before the MLP (Block_Encoder.norm)
    xn = _layernorm_f32(x1, g1_ref[...], be1_ref[...], eps)

    # MLP: fc1 -> exact erf GELU (matches torch.nn.GELU default) -> fc2
    h = jnp.dot(xn.astype(w1_ref.dtype), w1_ref[...],
                preferred_element_type=jnp.float32) + b1_ref[...]
    h = 0.5 * h * (1.0 + lax.erf(h * 0.7071067811865476))
    y = jnp.dot(h.astype(w2_ref.dtype), w2_ref[...],
                preferred_element_type=jnp.float32) + b2_ref[...]
    x2 = x1 + y                                           # residual 2

    # final LayerNorm (CrossAttention.norm); cast only at the store
    out = _layernorm_f32(x2, g2_ref[...], be2_ref[...], eps)
    o_ref[...] = out.astype(o_ref.dtype)


def post_block_pallas(q_in, ctx, pp, *, eps=1e-5, tile_m=256):
    B, Nq, C = q_in.shape
    Hd = pp["w1_t"].shape[1]
    M = B * Nq
    # Large tile to amortize per-step overhead; shrink / pad for small or
    # ragged token counts (multiple of 8 sublanes for f32).
    tm = tile_m if M >= tile_m else _round_up(M, 8)
    Mp = _round_up(M, tm)

    x2 = q_in.reshape(M, C)
    c2 = ctx.reshape(M, C)
    if Mp != M:
        x2 = jnp.pad(x2, ((0, Mp - M), (0, 0)))
        c2 = jnp.pad(c2, ((0, Mp - M), (0, 0)))

    kern = functools.partial(_post_block_kernel, eps=eps)
    const = lambda i: (0, 0)
    out = pl.pallas_call(
        kern,
        out_shape=jax.ShapeDtypeStruct((Mp, C), q_in.dtype),
        grid_spec=pltpu.PrefetchScalarGridSpec(
            num_scalar_prefetch=0,
            grid=(Mp // tm,),
            in_specs=[
                pl.BlockSpec((tm, C), lambda i: (i, 0)),   # residual base tile
                pl.BlockSpec((tm, C), lambda i: (i, 0)),   # attention ctx tile
                pl.BlockSpec((C, C), const),               # proj weight (resident)
                pl.BlockSpec((1, C), const),               # proj bias
                pl.BlockSpec((1, C), const),               # LN1 gamma
                pl.BlockSpec((1, C), const),               # LN1 beta
                pl.BlockSpec((C, Hd), const),              # fc1 weight (resident)
                pl.BlockSpec((1, Hd), const),              # fc1 bias
                pl.BlockSpec((Hd, C), const),              # fc2 weight (resident)
                pl.BlockSpec((1, C), const),               # fc2 bias
                pl.BlockSpec((1, C), const),               # LN2 gamma
                pl.BlockSpec((1, C), const),               # LN2 beta
            ],
            out_specs=pl.BlockSpec((tm, C), lambda i: (i, 0)),
        ),
        compiler_params=pltpu.CompilerParams(
            dimension_semantics=("parallel",),
            vmem_limit_bytes=32 * 1024 * 1024),
    )(x2, c2, pp["wproj_t"], pp["bproj"], pp["ln1_w"], pp["ln1_b"],
      pp["w1_t"], pp["b1"], pp["w2_t"], pp["b2"], pp["ln2_w"], pp["ln2_b"])

    return out[:M].reshape(B, Nq, C)


# ---------------------------------------------------------------------------
# One-time parameter prep (hoists all transposes / reshapes out of the forward)
# ---------------------------------------------------------------------------
def prepare_params(p, num_heads):
    C = p["wq"].shape[0]
    D = C // num_heads

    def per_head(w):  # PyTorch [out=C, in=C] -> [H, C_in, D_out]
        return jnp.transpose(w).reshape(C, num_heads, D).transpose(1, 0, 2)

    vec = lambda a: a.reshape(1, -1).astype(jnp.float32)
    return {
        "wq_h": per_head(p["wq"]),
        "wk_h": per_head(p["wk"]),
        "wv_h": per_head(p["wv"]),
        "wproj_t": jnp.transpose(p["wproj"]),
        "bproj": vec(p["bproj"]),
        "ln1_w": vec(p["ln1_w"]), "ln1_b": vec(p["ln1_b"]),
        "w1_t": jnp.transpose(p["w1"]), "b1": vec(p["b1"]),
        "w2_t": jnp.transpose(p["w2"]), "b2": vec(p["b2"]),
        "ln2_w": vec(p["ln2_w"]), "ln2_b": vec(p["ln2_b"]),
        "num_heads": num_heads,
        "head_dim": D,
    }


def cross_attention_pallas(q, k, v, pp):
    B, Nq, C = q.shape
    H, D = pp["num_heads"], pp["head_dim"]
    scale = float(D) ** -0.5
    ctx_h = attention_pallas(q, k, v, pp["wq_h"], pp["wk_h"], pp["wv_h"],
                             scale=scale)                      # (B, H, Nq, D)
    ctx = ctx_h.transpose(0, 2, 1, 3).reshape(B, Nq, C)        # (B, Nq, C)
    return post_block_pallas(q, ctx, pp)


# ---------------------------------------------------------------------------
# Pure-JAX reference mirroring the PyTorch forward (eval mode)
# ---------------------------------------------------------------------------
def cross_attention_reference(q, k, v, p, num_heads, eps=1e-5):
    B, Nq, C = q.shape
    D = C // num_heads
    scale = D ** -0.5

    def lin(x, w, b=None):
        y = jnp.einsum("bnc,oc->bno", x, w)
        return y if b is None else y + b

    def ln(t, g, b):
        mu = t.mean(-1, keepdims=True)
        var = ((t - mu) ** 2).mean(-1, keepdims=True)
        return (t - mu) / jnp.sqrt(var + eps) * g + b

    qh = lin(q, p["wq"]).reshape(B, Nq, num_heads, D).transpose(0, 2, 1, 3)
    kh = lin(k, p["wk"]).reshape(B, -1, num_heads, D).transpose(0, 2, 1, 3)
    vh = lin(v, p["wv"]).reshape(B, -1, num_heads, D).transpose(0, 2, 1, 3)
    attn = jax.nn.softmax(jnp.einsum("bhqd,bhkd->bhqk", qh, kh) * scale, -1)
    ctx = jnp.einsum("bhqk,bhkd->bhqd", attn, vh)
    ctx = ctx.transpose(0, 2, 1, 3).reshape(B, Nq, C)

    x = q + lin(ctx, p["wproj"], p["bproj"])
    xn = ln(x, p["ln1_w"], p["ln1_b"])
    h = lin(xn, p["w1"], p["b1"])
    h = 0.5 * h * (1.0 + lax.erf(h / jnp.sqrt(2.0)))
    x = x + lin(h, p["w2"], p["b2"])
    return ln(x, p["ln2_w"], p["ln2_b"])


if __name__ == "__main__":
    # Small deterministic configuration matching the module defaults:
    # dim=256, num_heads=4 (head_dim=64), mlp_ratio=2.0 -> hidden=512.
    B, Nq, Nkv = 2, 8, 16
    dim, num_heads, mlp_ratio = 256, 4, 2.0
    hidden = int(dim * mlp_ratio)

    key = jax.random.PRNGKey(0)
    ks = jax.random.split(key, 18)
    std = 0.02

    q = jax.random.normal(ks[0], (B, Nq, dim), jnp.float32)
    k = jax.random.normal(ks[1], (B, Nkv, dim), jnp.float32)
    v = jax.random.normal(ks[2], (B, Nkv, dim), jnp.float32)

    # Synthetic checkpoint (PyTorch Linear layout: weight [out, in], bias [out]).
    params = {
        "wq": jax.random.normal(ks[3], (dim, dim), jnp.float32) * std,
        "wk": jax.random.normal(ks[4], (dim, dim), jnp.float32) * std,
        "wv": jax.random.normal(ks[5], (dim, dim), jnp.float32) * std,
        "wproj": jax.random.normal(ks[6], (dim, dim), jnp.float32) * std,
        "bproj": jax.random.normal(ks[7], (dim,), jnp.float32) * std,
        "ln1_w": 1.0 + jax.random.normal(ks[8], (dim,), jnp.float32) * 0.1,
        "ln1_b": jax.random.normal(ks[9], (dim,), jnp.float32) * 0.1,
        "w1": jax.random.normal(ks[10], (hidden, dim), jnp.float32) * std,
        "b1": jax.random.normal(ks[11], (hidden,), jnp.float32) * std,
        "w2": jax.random.normal(ks[12], (dim, hidden), jnp.float32) * std,
        "b2": jax.random.normal(ks[13], (dim,), jnp.float32) * std,
        "ln2_w": 1.0 + jax.random.normal(ks[14], (dim,), jnp.float32) * 0.1,
        "ln2_b": jax.random.normal(ks[15], (dim,), jnp.float32) * 0.1,
    }

    prepped = prepare_params(params, num_heads)   # one-time layout prep

    out = cross_attention_pallas(q, k, v, prepped)
    out = jax.block_until_ready(out)

    ref = cross_attention_reference(q, k, v, params, num_heads)
    assert out.shape == (B, Nq, dim)
    assert jnp.allclose(out, ref, atol=1e-3, rtol=1e-3), (
        "mismatch vs reference: max abs diff = %e" % float(jnp.max(jnp.abs(out - ref))))

    print("KERNEL_OK")
</pallas_src>

<mosaic_0001>
module attributes {stable_mosaic.version = 11 : i64} {
  func.func @_attention_kernel(%arg0: i32, %arg1: i32, %arg2: memref<1x8x256xf32, #tpu.memory_space<vmem>>, %arg3: memref<1x16x256xf32, #tpu.memory_space<vmem>>, %arg4: memref<1x16x256xf32, #tpu.memory_space<vmem>>, %arg5: memref<1x256x64xf32, #tpu.memory_space<vmem>>, %arg6: memref<1x256x64xf32, #tpu.memory_space<vmem>>, %arg7: memref<1x256x64xf32, #tpu.memory_space<vmem>>, %arg8: memref<1x1x8x64xf32, #tpu.memory_space<vmem>>) attributes {dimension_semantics = [#tpu.dimension_semantics<parallel>, #tpu.dimension_semantics<parallel>], iteration_bounds = array<i64: 2, 4>, scalar_prefetch = 0 : i64, scratch_operands = 0 : i64, tpu.core_type = #tpu.core_type<tc>, window_params = [{transform_indices = @transform_0, window_bounds = array<i64: 1, 8, 256>}, {transform_indices = @transform_1, window_bounds = array<i64: 1, 16, 256>}, {transform_indices = @transform_2, window_bounds = array<i64: 1, 16, 256>}, {transform_indices = @transform_3, window_bounds = array<i64: 1, 256, 64>}, {transform_indices = @transform_4, window_bounds = array<i64: 1, 256, 64>}, {transform_indices = @transform_5, window_bounds = array<i64: 1, 256, 64>}, {transform_indices = @transform_6, window_bounds = array<i64: 1, 1, 8, 64>}]} {
    %c0 = arith.constant 0 : index
    %c0_0 = arith.constant 0 : index
    %c0_1 = arith.constant 0 : index
    %0 = vector.load %arg2[%c0, %c0_0, %c0_1] : memref<1x8x256xf32, #tpu.memory_space<vmem>>, vector<1x8x256xf32>
    %1 = vector.shape_cast %0 : vector<1x8x256xf32> to vector<8x256xf32>
    %c0_2 = arith.constant 0 : index
    %c0_3 = arith.constant 0 : index
    %c0_4 = arith.constant 0 : index
    %2 = vector.load %arg3[%c0_2, %c0_3, %c0_4] : memref<1x16x256xf32, #tpu.memory_space<vmem>>, vector<1x16x256xf32>
    %3 = vector.shape_cast %2 : vector<1x16x256xf32> to vector<16x256xf32>
    %c0_5 = arith.constant 0 : index
    %c0_6 = arith.constant 0 : index
    %c0_7 = arith.constant 0 : index
    %4 = vector.load %arg4[%c0_5, %c0_6, %c0_7] : memref<1x16x256xf32, #tpu.memory_space<vmem>>, vector<1x16x256xf32>
    %5 = vector.shape_cast %4 : vector<1x16x256xf32> to vector<16x256xf32>
    %c0_8 = arith.constant 0 : index
    %c0_9 = arith.constant 0 : index
    %c0_10 = arith.constant 0 : index
    %6 = vector.load %arg5[%c0_8, %c0_9, %c0_10] : memref<1x256x64xf32, #tpu.memory_space<vmem>>, vector<1x256x64xf32>
    %7 = vector.shape_cast %6 : vector<1x256x64xf32> to vector<256x64xf32>
    %c0_11 = arith.constant 0 : index
    %c0_12 = arith.constant 0 : index
    %c0_13 = arith.constant 0 : index
    %8 = vector.load %arg6[%c0_11, %c0_12, %c0_13] : memref<1x256x64xf32, #tpu.memory_space<vmem>>, vector<1x256x64xf32>
    %9 = vector.shape_cast %8 : vector<1x256x64xf32> to vector<256x64xf32>
    %c0_14 = arith.constant 0 : index
    %c0_15 = arith.constant 0 : index
    %c0_16 = arith.constant 0 : index
    %10 = vector.load %arg7[%c0_14, %c0_15, %c0_16] : memref<1x256x64xf32, #tpu.memory_space<vmem>>, vector<1x256x64xf32>
    %11 = vector.shape_cast %10 : vector<1x256x64xf32> to vector<256x64xf32>
    %cst = arith.constant dense<0.000000e+00> : vector<8x64xf32>
    %12 = tpu.matmul %1, %7, %cst {dimension_numbers = #tpu.dot_dimension_numbers<[1], [0], [0], [1], [0, 0, 1, 1], [], []>} : vector<8x256xf32>, vector<256x64xf32>, vector<8x64xf32> -> vector<8x64xf32>
    %cst_17 = arith.constant dense<0.000000e+00> : vector<16x64xf32>
    %13 = tpu.matmul %3, %9, %cst_17 {dimension_numbers = #tpu.dot_dimension_numbers<[1], [0], [0], [1], [0, 0, 1, 1], [], []>} : vector<16x256xf32>, vector<256x64xf32>, vector<16x64xf32> -> vector<16x64xf32>
    %cst_18 = arith.constant dense<0.000000e+00> : vector<16x64xf32>
    %14 = tpu.matmul %5, %11, %cst_18 {dimension_numbers = #tpu.dot_dimension_numbers<[1], [0], [0], [1], [0, 0, 1, 1], [], []>} : vector<16x256xf32>, vector<256x64xf32>, vector<16x64xf32> -> vector<16x64xf32>
    %cst_19 = arith.constant dense<0.000000e+00> : vector<8x16xf32>
    %15 = tpu.matmul %12, %13, %cst_19 {dimension_numbers = #tpu.dot_dimension_numbers<[1], [1], [0], [0], [0, 0, 1, 0], [], []>} : vector<8x64xf32>, vector<16x64xf32>, vector<8x16xf32> -> vector<8x16xf32>
    %cst_20 = arith.constant 1.250000e-01 : f32
    %16 = vector.broadcast %cst_20 : f32 to vector<8x16xf32>
    %17 = arith.mulf %15, %16 : vector<8x16xf32>
    %cst_21 = arith.constant dense<0xFF800000> : vector<8xf32>
    %18 = vector.multi_reduction <maximumf>, %17, %cst_21 [1] : vector<8x16xf32> to vector<8xf32>
    %19 = vector.shape_cast %18 : vector<8xf32> to vector<8x1xf32>
    %20 = vector.broadcast %19 : vector<8x1xf32> to vector<8x16xf32>
    %21 = arith.subf %17, %20 : vector<8x16xf32>
    %22 = math.exp %21 : vector<8x16xf32>
    %cst_22 = arith.constant dense<0.000000e+00> : vector<8xf32>
    %23 = vector.multi_reduction <add>, %22, %cst_22 [1] : vector<8x16xf32> to vector<8xf32>
    %24 = vector.shape_cast %23 : vector<8xf32> to vector<8x1xf32>
    %25 = vector.broadcast %24 : vector<8x1xf32> to vector<8x16xf32>
    %26 = arith.divf %22, %25 : vector<8x16xf32>
    %cst_23 = arith.constant dense<0.000000e+00> : vector<8x64xf32>
    %27 = tpu.matmul %26, %14, %cst_23 {dimension_numbers = #tpu.dot_dimension_numbers<[1], [0], [0], [1], [0, 0, 1, 1], [], []>} : vector<8x16xf32>, vector<16x64xf32>, vector<8x64xf32> -> vector<8x64xf32>
    %c0_24 = arith.constant 0 : index
    %c0_25 = arith.constant 0 : index
    %c0_26 = arith.constant 0 : index
    %c0_27 = arith.constant 0 : index
    %28 = vector.load %arg8[%c0_24, %c0_25, %c0_26, %c0_27] : memref<1x1x8x64xf32, #tpu.memory_space<vmem>>, vector<1x1x8x64xf32>
    %29 = vector.shape_cast %28 : vector<1x1x8x64xf32> to vector<8x64xf32>
    %30 = vector.shape_cast %27 : vector<8x64xf32> to vector<1x1x8x64xf32>
    tpu.vector_store %arg8[%c0_24, %c0_25, %c0_26, %c0_27], %30 {strides = array<i32>} : memref<1x1x8x64xf32, #tpu.memory_space<vmem>>, vector<1x1x8x64xf32>,
    return
  }
  func.func @transform_0(%arg0: i32, %arg1: i32) -> (i32, i32, i32) {
    %c0_i32 = arith.constant 0 : i32
    %c0_i32_0 = arith.constant 0 : i32
    %c0_i32_1 = arith.constant 0 : i32
    return %arg0, %c0_i32, %c0_i32_0 : i32, i32, i32
  }
  func.func @transform_1(%arg0: i32, %arg1: i32) -> (i32, i32, i32) {
    %c0_i32 = arith.constant 0 : i32
    %c0_i32_0 = arith.constant 0 : i32
    %c0_i32_1 = arith.constant 0 : i32
    return %arg0, %c0_i32, %c0_i32_0 : i32, i32, i32
  }
  func.func @transform_2(%arg0: i32, %arg1: i32) -> (i32, i32, i32) {
    %c0_i32 = arith.constant 0 : i32
    %c0_i32_0 = arith.constant 0 : i32
    %c0_i32_1 = arith.constant 0 : i32
    return %arg0, %c0_i32, %c0_i32_0 : i32, i32, i32
  }
  func.func @transform_3(%arg0: i32, %arg1: i32) -> (i32, i32, i32) {
    %c0_i32 = arith.constant 0 : i32
    %c0_i32_0 = arith.constant 0 : i32
    %c0_i32_1 = arith.constant 0 : i32
    return %arg1, %c0_i32, %c0_i32_0 : i32, i32, i32
  }
  func.func @transform_4(%arg0: i32, %arg1: i32) -> (i32, i32, i32) {
    %c0_i32 = arith.constant 0 : i32
    %c0_i32_0 = arith.constant 0 : i32
    %c0_i32_1 = arith.constant 0 : i32
    return %arg1, %c0_i32, %c0_i32_0 : i32, i32, i32
  }
  func.func @transform_5(%arg0: i32, %arg1: i32) -> (i32, i32, i32) {
    %c0_i32 = arith.constant 0 : i32
    %c0_i32_0 = arith.constant 0 : i32
    %c0_i32_1 = arith.constant 0 : i32
    return %arg1, %c0_i32, %c0_i32_0 : i32, i32, i32
  }
  func.func @transform_6(%arg0: i32, %arg1: i32) -> (i32, i32, i32, i32) {
    %c0_i32 = arith.constant 0 : i32
    %c0_i32_0 = arith.constant 0 : i32
    %c0_i32_1 = arith.constant 0 : i32
    return %arg0, %arg1, %c0_i32, %c0_i32_0 : i32, i32, i32, i32
  }
}

</mosaic_0001>

<bundles_post_ra>
// kernel: tpu_custom_call.1
= control target key start
LH: loop header
LB: loop body
LE: loop exit
PB: predicated region body
PF: predicated region fallthrough
CT: control target
= control target key end

     0   :  { %11 = vsyncpa [#allocation3], 0  ;;  %s1673_s0 = inlined_call_operand.vmem [shape: f32[2,8,256], index: 0, kind: input, shape index: {}]   ;;  %s1674_s1 = inlined_call_operand.vmem [shape: f32[2,16,256], index: 1, kind: input, shape index: {}]   ;;  %s1675_s2 = inlined_call_operand.vmem [shape: f32[2,16,256], index: 2, kind: input, shape index: {}]   ;;  %s1676_s3 = inlined_call_operand.vmem [shape: f32[4,256,64], index: 3, kind: input, shape index: {}]   ;;  %s1677_s4 = inlined_call_operand.vmem [shape: f32[4,256,64], index: 4, kind: input, shape index: {}]   ;;  %s1678_s5 = inlined_call_operand.vmem [shape: f32[4,256,64], index: 5, kind: input, shape index: {}]   ;;  %s1679_s6 = inlined_call_operand.hbm [shape: f32[2,4,8,64], index: 6, kind: output, shape index: {}]  }
   0x1   :  { %13 = vsyncpa [#allocation3 + $0x1], 0  ;;  %s1378_s21 = smov 0   ;;  %s1380_s22 = smov 0  }
   0x2   :  { %s1382_s23 = smov 0   ;;  %s1384_s24 = smov 0  }
   0x3   :  { %s1386_s25 = smov 0   ;;  %s1388_s26 = smov 0  }
   0x4   :  { %s1390_s27 = smov 0   ;;  %s1392_s28 = smov 0  }
   0x5 LB: > { %s1005_s29 = sadd.s32 4294967295, %s1338_s28   ;;  %s1006_s30 = sadd.s32 4294967294, %s1338_s28   ;;  %s1338_s28 = sphi %s1392_s28, %s19_s28   ;;  %s1334_s27 = sphi %s1390_s27, %s1688_s27   ;;  %s1330_s26 = sphi %s1388_s26, %s1687_s26   ;;  %s1326_s25 = sphi %s1386_s25, %s1686_s25   ;;  %s1322_s24 = sphi %s1384_s24, %s1685_s24   ;;  %s1318_s23 = sphi %s1382_s23, %s1684_s23   ;;  %s1314_s22 = sphi %s1380_s22, %s1683_s22   ;;  %s1310_s21 = sphi %s1378_s21, %s1682_s21  }
   0x6   : > { %s28_s7 = sadd.s32 1, %s1330_s26  ;;  %s31_s8 = sadd.s32 1, %s1334_s27 }
   0x7   : > { %p29_p0 = scmp.ge.s32.totalorder %s28_s7, 4  ;;  %p206_p1 = scmp.ne.s32.totalorder %s1318_s23, %s1314_s22 }
   0x8   : > { %p207_p2 = scmp.eq.s32.totalorder %s1005_s29, 7  ;;  %p212_p5 = scmp.ne.s32.totalorder %s1314_s22, %s1310_s21 }
   0x9   : > { %s1690_s7 = smov (%p29_p0, %s28_s7), 0  ;;  %s1692_s8 = smov (!%p29_p0, %s31_s8), %s1334_s27 }
   0xa   : > { %s192_s9 = ssub.s32 %s1330_s26, %s1690_s7  ;;  %p1429_p3 = por %p207_p2, %p206_p1 }
   0xb   : > { %p33_p4 = scmp.ge.s32.totalorder %s1692_s8, 2  ;;  %p213_p6 = scmp.eq.s32.totalorder %s1006_s30, 7 }
   0xc   : > { %p1009_p7 = scmp.ge.s32.totalorder %s1338_s28, 1  ;;  %p279_p9 = scmp.lt.s32.totalorder %s1338_s28, 9 }
   0xd   : > { %s1694_s8 = smov (%p33_p4, %s1692_s8), 0  ;;  %p1438_p8 = por %p213_p6, %p212_p5 }
   0xe   : > { %s191_s12 = ssub.s32 %s1334_s27, %s1694_s8  ;;  %s196_s13 = sadd.s32 1, %s1318_s23 }
   0xf   : > { %s193_s14 = sor.u32 %s192_s9, %s191_s12  ;;  %p280_p10 = pnand %p1009_p7, %p279_p9 }
  0x10   : > { %p194_p11 = scmp.eq.s32.totalorder %s193_s14, 0  ;;  %p349_p12 = scmp.lt.s32.totalorder (!%p280_p10), %s1322_s24, 3 }
  0x11   : > { %283 = sbr.rel (%p280_p10) target bundleno = 981 (0x3d5), region = 44  ;;  %p334_p13 = scmp.lt.s32.totalorder (!%p280_p10), %s1326_s25, 1 }
  0x12   : > { %s1447_s15 = scalar_select %p194_p11, %s1318_s23, %s196_s13  }
  0x13   : > { %s1028_s29 = sshll.u32 (!%p280_p10), %s1326_s25, 2 }
  0x14   : > { %s869_s30 = sadd.s32 (!%p280_p10), %s1322_s24, %s1028_s29 }
  0x16   : > { %s350_s16 = scalar_select %p349_p12, %s1322_s24, 3  ;;  %vm1341_vm0 = vmmov 0   ;;  %vm690_vm1 = vcmask 523264   ;;  %vm771_vm2 = vcmask 130048  }
  0x17   : > { %s1498_s12 = scalar_select %p334_p13, %s1326_s25, 1 }
  0x18   : > { %s1451_s17 = sshll.u32 %s350_s16, 8  ;;  %s1342_s24 = smov [#allocation2]  }
  0x19   : > { %s1457_s20 = scalar_lea.vmem %s1677_s4, %s1451_s17  ;;  %s1466_s9 = scalar_lea.vmem %s1676_s3, %s1451_s17 }
  0x1a   : > { %v437_v0 = vld [vmem:[%s1457_s20 + $0xf8] sm:$0xff]  ;;  %v436_v2 = vld [vmem:[%s1457_s20 + $0xf0] sm:$0xff]  ;;  %v435_v4 = vld [vmem:[%s1457_s20 + $0xe8] sm:$0xff]  ;;  %s1033_s13 = sshll.u32 %s1498_s12, 5  ;;  %s1032_s19 = sshll.u32 %s1498_s12, 4 }
  0x1b   : > { %v421_v1 = vld [vmem:[%s1457_s20 + $0x78] sm:$0xff]  ;;  %1073 = vmatprep.subr.mxu1 %v437_v0  ;;  %v420_v3 = vld [vmem:[%s1457_s20 + $0x70] sm:$0xff]  ;;  %v419_v5 = vld [vmem:[%s1457_s20 + $0x68] sm:$0xff]  ;;  %s1520_s18 = scalar_lea.vmem %s1674_s1, %s1033_s13  ;;  %s338_s14 = scalar_lea.vmem %s1673_s0, %s1032_s19 }
  0x1c   : > { %1074 = vmatpush3.msra.mxu1 %v421_v1  ;;  %v405_v6 = vld [vmem:[%s1466_s9 + $0xf8] sm:$0xff]  ;;  %v434_v7 = vld [vmem:[%s1457_s20 + $0xe0] sm:$0xff]  ;;  %v404_v9 = vld [vmem:[%s1466_s9 + $0xf0] sm:$0xff]  ;;  %s1565_s16 = scalar_lea.vmem %s1678_s5, %s1451_s17  ;;  %s1582_s19 = scalar_lea.vmem %s1675_s2, %s1033_s13 }
  0x1d   : > { %1075 = vmatprep.subr.mxu1 %v436_v2  ;;  %1038 = vmatprep.subr.mxu0 %v405_v6  ;;  %v389_v8 = vld [vmem:[%s1466_s9 + $0x78] sm:$0xff]  ;;  %v418_v10 = vld [vmem:[%s1457_s20 + $0x60] sm:$0xff]  ;;  %v388_v11 = vld [vmem:[%s1466_s9 + $0x70] sm:$0xff]  ;;  %v1340_v6 = vmov 0.0   ;;  %s331_s12 = sand.u32 1, %s1314_s22  }
  0x1e   : > { %1076 = vmatpush3.msra.mxu1 %v420_v3  ;;  %1039 = vmatpush3.msra.mxu0 %v389_v8  ;;  %v433_v12 = vld [vmem:[%s1457_s20 + $0xd8] sm:$0xff]  ;;  %v403_v13 = vld [vmem:[%s1466_s9 + $0xe8] sm:$0xff]  ;;  %v402_v16 = vld [vmem:[%s1466_s9 + $0xe0] sm:$0xff]  ;;  %s1010_s13 = sshll.u32 %s331_s12, 3 }
  0x1f   : > { %1077 = vmatprep.subr.mxu1 %v435_v4  ;;  %1040 = vmatprep.subr.mxu0 %v404_v9  ;;  %v387_v14 = vld [vmem:[%s1466_s9 + $0x68] sm:$0xff]  ;;  %v417_v15 = vld [vmem:[%s1457_s20 + $0x58] sm:$0xff]  ;;  %v432_v17 = vld [vmem:[%s1457_s20 + $0xd0] sm:$0xff] }
  0x20   : > { %1078 = vmatpush3.msra.mxu1 %v419_v5  ;;  %1041 = vmatpush3.msra.mxu0 %v388_v11  ;;  %v386_v18 = vld [vmem:[%s1466_s9 + $0x60] sm:$0xff]  ;;  %v416_v19 = vld [vmem:[%s1457_s20 + $0x50] sm:$0xff]  ;;  %v401_v20 = vld [vmem:[%s1466_s9 + $0xd8] sm:$0xff] }
  0x21   : > { %1079 = vmatprep.subr.mxu1 %v434_v7  ;;  %1042 = vmatprep.subr.mxu0 %v403_v13  ;;  %v431_v21 = vld [vmem:[%s1457_s20 + $0xc8] sm:$0xff]  ;;  %v385_v22 = vld [vmem:[%s1466_s9 + $0x58] sm:$0xff]  ;;  %v400_v24 = vld [vmem:[%s1466_s9 + $0xd0] sm:$0xff] }
  0x22   : > { %1080 = vmatpush3.msra.mxu1 %v418_v10  ;;  %1043 = vmatpush3.msra.mxu0 %v387_v14  ;;  %v415_v23 = vld [vmem:[%s1457_s20 + $0x48] sm:$0xff]  ;;  %v430_v25 = vld [vmem:[%s1457_s20 + $0xc0] sm:$0xff]  ;;  %v384_v26 = vld [vmem:[%s1466_s9 + $0x50] sm:$0xff] }
  0x23   : > { %1081 = vmatprep.subr.mxu1 %v433_v12  ;;  %1044 = vmatprep.subr.mxu0 %v402_v16  ;;  %v414_v27 = vld [vmem:[%s1457_s20 + $0x40] sm:$0xff]  ;;  %v399_v28 = vld [vmem:[%s1466_s9 + $0xc8] sm:$0xff]  ;;  %v429_v29 = vld [vmem:[%s1457_s20 + $0xb8] sm:$0xff] }
  0x24   : > { %1082 = vmatpush3.msra.mxu1 %v417_v15  ;;  %1045 = vmatpush3.msra.mxu0 %v386_v18  ;;  %v383_v30 = vld [vmem:[%s1466_s9 + $0x48] sm:$0xff]  ;;  %v413_v31 = vld [vmem:[%s1457_s20 + $0x38] sm:$0xff]  ;;  %v398_v32 = vld [vmem:[%s1466_s9 + $0xc0] sm:$0xff] }
  0x25   : > { %1083 = vmatprep.subr.mxu1 %v432_v17  ;;  %1046 = vmatprep.subr.mxu0 %v401_v20  ;;  %v428_v33 = vld [vmem:[%s1457_s20 + $0xb0] sm:$0xff]  ;;  %v382_v34 = vld [vmem:[%s1466_s9 + $0x40] sm:$0xff]  ;;  %v397_v36 = vld [vmem:[%s1466_s9 + $0xb8] sm:$0xff] }
  0x26   : > { %1084 = vmatpush3.msra.mxu1 %v416_v19  ;;  %1047 = vmatpush3.msra.mxu0 %v385_v22  ;;  %v412_v35 = vld [vmem:[%s1457_s20 + $0x30] sm:$0xff]  ;;  %v427_v37 = vld [vmem:[%s1457_s20 + $0xa8] sm:$0xff]  ;;  %v381_v38 = vld [vmem:[%s1466_s9 + $0x38] sm:$0xff] }
  0x27   : > { %1085 = vmatprep.subr.mxu1 %v431_v21  ;;  %1048 = vmatprep.subr.mxu0 %v400_v24  ;;  %v411_v39 = vld [vmem:[%s1457_s20 + $0x28] sm:$0xff]  ;;  %v396_v40 = vld [vmem:[%s1466_s9 + $0xb0] sm:$0xff]  ;;  %v426_v41 = vld [vmem:[%s1457_s20 + $0xa0] sm:$0xff] }
  0x28   : > { %1086 = vmatpush3.msra.mxu1 %v415_v23  ;;  %1049 = vmatpush3.msra.mxu0 %v384_v26  ;;  %v380_v42 = vld [vmem:[%s1466_s9 + $0x30] sm:$0xff]  ;;  %v410_v43 = vld [vmem:[%s1457_s20 + $0x20] sm:$0xff]  ;;  %v395_v44 = vld [vmem:[%s1466_s9 + $0xa8] sm:$0xff] }
  0x29   : > { %1087 = vmatprep.subr.mxu1 %v430_v25  ;;  %1050 = vmatprep.subr.mxu0 %v399_v28  ;;  %v425_v45 = vld [vmem:[%s1457_s20 + $0x98] sm:$0xff]  ;;  %v379_v46 = vld [vmem:[%s1466_s9 + $0x28] sm:$0xff]  ;;  %v424_v49 = vld [vmem:[%s1457_s20 + $0x90] sm:$0xff] }
  0x2a   : > { %1088 = vmatpush3.msra.mxu1 %v414_v27  ;;  %1051 = vmatpush3.msra.mxu0 %v383_v30  ;;  %v409_v47 = vld [vmem:[%s1457_s20 + $0x18] sm:$0xff]  ;;  %v367_v48 = vld [vmem:[%s1520_s18 + $0x8] sm:$0xff]  ;;  %v394_v50 = vld [vmem:[%s1466_s9 + $0xa0] sm:$0xff] }
  0x2b   : > { %1089 = vmatprep.subr.mxu1 %v429_v29  ;;  %1052 = vmatprep.subr.mxu0 %v398_v32  ;;  %v408_v51 = vld [vmem:[%s1457_s20 + $0x10] sm:$0xff]  ;;  %v378_v52 = vld [vmem:[%s1466_s9 + $0x20] sm:$0xff]  ;;  %v423_v53 = vld [vmem:[%s1457_s20 + $0x88] sm:$0xff] }
  0x2c   : > { %1090 = vmatpush3.msra.mxu1 %v413_v31  ;;  %1053 = vmatpush3.msra.mxu0 %v382_v34  ;;  %v393_v54 = vld [vmem:[%s1466_s9 + $0x98] sm:$0xff]  ;;  %v407_v55 = vld [vmem:[%s1457_s20 + $0x8] sm:$0xff]  ;;  %v422_v57 = vld [vmem:[%s1457_s20 + $0x80] sm:$0xff] }
  0x2d   : > { %1091 = vmatprep.subr.mxu1 %v428_v33  ;;  %1054 = vmatprep.subr.mxu0 %v397_v36  ;;  %v377_v56 = vld [vmem:[%s1466_s9 + $0x18] sm:$0xff]  ;;  %v392_v58 = vld [vmem:[%s1466_s9 + $0x90] sm:$0xff]  ;;  %v406_v59 = vld [vmem:[%s1457_s20] sm:$0xff]  ;;  %s333_s20 = scalar_lea.vmem [#allocation2], %s1010_s13  ;;  %s1250_s13 = sshll.u32 %s1342_s24, 4  ;;  %s1251_s13 = int_to_ptr.vmem [resolvable:$false] %s1250_s13 }
  0x2e   : > { %1092 = vmatpush3.msra.mxu1 %v412_v35  ;;  %1055 = vmatpush3.msra.mxu0 %v381_v38  ;;  %v376_v60 = vld [vmem:[%s1466_s9 + $0x10] sm:$0xff]  ;;  %v366_v61 = vld [vmem:[%s1520_s18] sm:$0xff]  ;;  %v391_v62 = vld [vmem:[%s1466_s9 + $0x88] sm:$0xff]  ;;  %s1252_s29 = scalar_lea.vmem %s1251_s13, 256 }
  0x2f   : > { %1093 = vmatprep.subr.mxu1 %v427_v37  ;;  %1056 = vmatprep.subr.mxu0 %v396_v40  ;;  %v369_v63 = vld [vmem:[%s1520_s18 + $0x18] sm:$0xff]  ;;  %v375_v0 = vld [vmem:[%s1466_s9 + $0x8] sm:$0xff]  ;;  %v390_v1 = vld [vmem:[%s1466_s9 + $0x80] sm:$0xff] }
  0x30   : > { %1094 = vmatpush3.msra.mxu1 %v411_v39  ;;  %1057 = vmatpush3.msra.mxu0 %v380_v42  ;;  %v365_v2 = vld [vmem:[%s338_s14 + $0x8] sm:$0xff]  ;;  %v374_v3 = vld [vmem:[%s1466_s9] sm:$0xff]  ;;  %v368_v4 = vld [vmem:[%s1520_s18 + $0x10] sm:$0xff]  ;;  %s873_s9 = sshll.u32 %s333_s20, 4  ;;  %s1622_s9 = int_to_ptr.vmem [resolvable:$true] %s873_s9 }
  0x31   : > { %1095 = vmatprep.subr.mxu1 %v426_v41  ;;  %1058 = vmatprep.subr.mxu0 %v395_v44  ;;  %v364_v5 = vld [vmem:[%s338_s14] sm:$0xff]  ;;  %v469_v16 = vld [vmem:[%s1565_s16 + $0xf8] sm:$0xff]  ;;  %v468_v18 = vld [vmem:[%s1565_s16 + $0xf0] sm:$0xff]  ;;  %s1029_s14 = sshll.u32 %s869_s30, 7  ;;  %s1246_s25 = scalar_lea.vmem %s1622_s9, 128 }
  0x32   : > { %1096 = vmatpush3.msra.mxu1 %v410_v43  ;;  %1059 = vmatpush3.msra.mxu0 %v379_v46  ;;  %v453_v17 = vld [vmem:[%s1565_s16 + $0x78] sm:$0xff]  ;;  %v452_v19 = vld [vmem:[%s1565_s16 + $0x70] sm:$0xff]  ;;  %v467_v20 = vld [vmem:[%s1565_s16 + $0xe8] sm:$0xff]  ;;  %s1620_s18 = scalar_lea.hbm %s1679_s6, %s1029_s14  ;;  %p1247_p0 = scmp.ne.s32.totalorder %s1622_s9, %s1246_s25 }
  0x33   : > { %1097 = vmatprep.subr.mxu1 %v425_v45  ;;  %604 = vmatprep.mubr.f32.mxu1 %v367_v48  ;;  %v451_v21 = vld [vmem:[%s1565_s16 + $0x68] sm:$0xff]  ;;  %v466_v22 = vld [vmem:[%s1565_s16 + $0xe0] sm:$0xff]  ;;  %v465_v24 = vld [vmem:[%s1565_s16 + $0xd8] sm:$0xff]  ;;  %p1253_p4 = scmp.lt.s32.totalorder %s1622_s9, %s1251_s13  ;;  %p1254_p5 = scmp.lt.s32.totalorder %s1252_s29, %s1246_s25 }
  0x34   : > { %1098 = vmatpush3.msra.mxu1 %v409_v47  ;;  %1060 = vmatprep.subr.mxu0 %v394_v50  ;;  %v450_v23 = vld [vmem:[%s1565_s16 + $0x60] sm:$0xff]  ;;  %v449_v25 = vld [vmem:[%s1565_s16 + $0x58] sm:$0xff]  ;;  %v464_v26 = vld [vmem:[%s1565_s16 + $0xd0] sm:$0xff]  ;;  %p1248_p1 = pnand %p1247_p0, %p1429_p3 }
  0x35   : > { %1099 = vmatprep.subr.mxu1 %v424_v49  ;;  %1061 = vmatpush3.msra.mxu0 %v378_v52  ;;  %v448_v27 = vld [vmem:[%s1565_s16 + $0x50] sm:$0xff]  ;;  %v463_v28 = vld [vmem:[%s1565_s16 + $0xc8] sm:$0xff]  ;;  %v462_v31 = vld [vmem:[%s1565_s16 + $0xc0] sm:$0xff]  ;;  %p1255_p6 = por %p1254_p5, %p1253_p4 }
  0x36   : > { %1100 = vmatpush3.msra.mxu1 %v408_v51  ;;  %1062 = vmatprep.subr.mxu0 %v393_v54  ;;  %v371_v29 = vld [vmem:[%s1582_s19 + $0x8] sm:$0xff]  ;;  %v446_v32 = vld [vmem:[%s1565_s16 + $0x40] sm:$0xff]  ;;  %v461_v33 = vld [vmem:[%s1565_s16 + $0xb8] sm:$0xff]  ;;  %p1249_p2 = pneg %p1248_p1 }
  0x37   : > { %1101 = vmatprep.subr.mxu1 %v423_v53  ;;  %1063 = vmatpush3.msra.mxu0 %v377_v56  ;;  %v447_v30 = vld [vmem:[%s1565_s16 + $0x48] sm:$0xff]  ;;  %v445_v34 = vld [vmem:[%s1565_s16 + $0x38] sm:$0xff]  ;;  %v460_v35 = vld [vmem:[%s1565_s16 + $0xb0] sm:$0xff] }
  0x38   : > { %1102 = vmatpush3.msra.mxu1 %v407_v55  ;;  %1064 = vmatprep.subr.mxu0 %v392_v58  ;;  %v444_v36 = vld [vmem:[%s1565_s16 + $0x30] sm:$0xff]  ;;  %v459_v37 = vld [vmem:[%s1565_s16 + $0xa8] sm:$0xff]  ;;  %v458_v39 = vld [vmem:[%s1565_s16 + $0xa0] sm:$0xff]  ;;  %p1256_p7 = pnand %p1255_p6, %p1249_p2 }
  0x39   : > { %1103 = vmatprep.subr.mxu1 %v422_v57  ;;  %1065 = vmatpush3.msra.mxu0 %v376_v60  ;;  %v443_v38 = vld [vmem:[%s1565_s16 + $0x28] sm:$0xff]  ;;  %v442_v40 = vld [vmem:[%s1565_s16 + $0x20] sm:$0xff]  ;;  %v457_v41 = vld [vmem:[%s1565_s16 + $0x98] sm:$0xff] }
  0x3a   : > { %1104 = vmatpush3.msra.mxu1 %v406_v59  ;;  %1066 = vmatprep.subr.mxu0 %v391_v62  ;;  %v441_v42 = vld [vmem:[%s1565_s16 + $0x18] sm:$0xff]  ;;  %v456_v43 = vld [vmem:[%s1565_s16 + $0x90] sm:$0xff]  ;;  %v455_v45 = vld [vmem:[%s1565_s16 + $0x88] sm:$0xff] }
  0x3b   : > { %605 = vmatmul.mubr.f32.vlgmr.msra.gmra.mxu1 %v366_v61  ;;  %1067 = vmatpush3.msra.mxu0 %v375_v0  ;;  %v440_v44 = vld [vmem:[%s1565_s16 + $0x10] sm:$0xff]  ;;  %v439_v46 = vld [vmem:[%s1565_s16 + $0x8] sm:$0xff]  ;;  %v454_v47 = vld [vmem:[%s1565_s16 + $0x80] sm:$0xff] }
  0x3c   : > { %609 = vmatprep.mubr.f32.mxu1 %v369_v63  ;;  %1068 = vmatprep.subr.mxu0 %v390_v1  ;;  %v438_v48 = vld [vmem:[%s1565_s16] sm:$0xff]  ;;  %v373_v50 = vld [vmem:[%s1582_s19 + $0x18] sm:$0xff]  ;;  %v372_v51 = vld [vmem:[%s1582_s19 + $0x10] sm:$0xff] }
  0x3d   : > { %534 = vmatprep.mubr.f32.mxu0 %v365_v2  ;;  %1069 = vmatpush3.msra.mxu0 %v374_v3  ;;  %v370_v49 = vld [vmem:[%s1582_s19] sm:$0xff]  ;;  %s858_s19 = scalar_lea.sflag [#allocation3], %s331_s12 }
  0x3e   : > { %535 = vmatmul.mubr.f32.vlgmr.msra.gmra.mxu0 %v364_v5  ;;  %1155 = vmatprep.subr.mxu1 %v1340_v6 }
  0x3f   : > { %610 = vmatmul.mubr.f32.gmra.mxu1 %v368_v4  ;;  %1111 = vmatprep.subr.mxu0 %v469_v16 }
  0x40   : > { %1159 = vmatprep.mubr.msk.f32.mxu1 %vm1341_vm0, %v1340_v6  ;;  %1112 = vmatpush3.msra.mxu0 %v453_v17 }
  0x41   : > { %1113 = vmatprep.subr.mxu0 %v468_v18  ;;  %679 = vmatprep.mubr.f32.mxu0 %v371_v29 }
  0x42   : > { %1114 = vmatpush3.msra.mxu0 %v452_v19 }
  0x43   : > { %1115 = vmatprep.subr.mxu0 %v467_v20 }
  0x44   : > { %1116 = vmatpush3.msra.mxu0 %v451_v21 }
  0x45   : > { %1117 = vmatprep.subr.mxu0 %v466_v22 }
  0x46   : > { %1118 = vmatpush3.msra.mxu0 %v450_v23 }
  0x47   : > { %1119 = vmatprep.subr.mxu0 %v465_v24 }
  0x48   : > { %1120 = vmatpush3.msra.mxu0 %v449_v25 }
  0x49   : > { %1121 = vmatprep.subr.mxu0 %v464_v26 }
  0x4a   : > { %1122 = vmatpush3.msra.mxu0 %v448_v27 }
  0x4b   : > { %1123 = vmatprep.subr.mxu0 %v463_v28 }
  0x4c   : > { %1124 = vmatpush3.msra.mxu0 %v447_v30 }
  0x4d   : > { %1125 = vmatprep.subr.mxu0 %v462_v31 }
  0x4e   : > { %1126 = vmatpush3.msra.mxu0 %v446_v32 }
  0x4f   : > { %1127 = vmatprep.subr.mxu0 %v461_v33 }
  0x50   : > { %1128 = vmatpush3.msra.mxu0 %v445_v34 }
  0x51   : > { %1129 = vmatprep.subr.mxu0 %v460_v35 }
  0x52   : > { %1130 = vmatpush3.msra.mxu0 %v444_v36 }
  0x53   : > { %1131 = vmatprep.subr.mxu0 %v459_v37 }
  0x54   : > { %1132 = vmatpush3.msra.mxu0 %v443_v38 }
  0x55   : > { %1133 = vmatprep.subr.mxu0 %v458_v39 }
  0x56   : > { %1134 = vmatpush3.msra.mxu0 %v442_v40 }
  0x57   : > { %1135 = vmatprep.subr.mxu0 %v457_v41 }
  0x58   : > { %1136 = vmatpush3.msra.mxu0 %v441_v42 }
  0x59   : > { %1137 = vmatprep.subr.mxu0 %v456_v43 }
  0x5a   : > { %1138 = vmatpush3.msra.mxu0 %v440_v44 }
  0x5b   : > { %1139 = vmatprep.subr.mxu0 %v455_v45 }
  0x5c   : > { %1140 = vmatpush3.msra.mxu0 %v439_v46 }
  0x5d   : > { %1141 = vmatprep.subr.mxu0 %v454_v47 }
  0x5e   : > { %1142 = vmatpush3.msra.mxu0 %v438_v48 }
  0x5f   : > { %680 = vmatmul.mubr.f32.vlgmr.msra.gmra.mxu0 %v370_v49 }
  0x60   : > { %684 = vmatprep.mubr.f32.mxu0 %v373_v50 }
  0x63   : > { %685 = vmatmul.mubr.f32.gmra.mxu0 %v372_v51 }
  0xfb   : > { %v1105_v7 = vpop.f32.mrf.mxu1 }
  0xfd   : > { %v1106_v8 = vpop.f32.mrf.mxu1 }
  0xfe   : > { %v1070_v12 = vpop.f32.mrf.mxu0  ;;  %v1107_v13 = vadd.f32 %v1106_v8, %v1105_v7 }
  0xff   : > { %v1108_v9 = vpop.f32.mrf.mxu1 }
 0x100   : > { %v1071_v14 = vpop.f32.mrf.mxu0 }
 0x101   : > { %v1109_v10 = vpop.f32.mrf.mxu1  ;;  %v1072_v15 = vadd.f32 %v1071_v14, %v1070_v12 }
 0x102   : > { %v1110_v11 = vadd.f32 %v1109_v10, %v1108_v9 }
 0x104   : > { %1156 = vmatpush3.xpose.msk.msra.mxu1 %vm690_vm1, %v1110_v11 }
 0x105   : > { %1157 = vmatprep.subr.mxu1 %v1340_v6 }
 0x108   : > { %1158 = vmatpush3.xpose.msk.msra.mxu1 %vm690_vm1, %v1107_v13 }
 0x109   : > { %1162 = vmatprep.subr.mxu1 %v1340_v6 }
 0x10b   : > { %1160 = vmatmul.mubr.msk.f32.vlgmr.msra.gmra.mxu1 %vm690_vm1, %v1072_v15 }
 0x10c   : > { %1166 = vmatprep.mubr.msk.f32.mxu1 %vm1341_vm0, %v1340_v6 }
 0x11f   : > { %v1143_v61 = vpop.f32.mrf.mxu0 }
 0x121   : > { %v1144_v62 = vpop.f32.mrf.mxu0 }
 0x122   : > { %v1145_v1 = vadd.f32 %v1144_v62, %v1143_v61 }
 0x123   : > { %v1146_v63 = vpop.f32.mrf.mxu0 }
 0x125   : > { %v1147_v0 = vpop.f32.mrf.mxu0 }
 0x126   : > { %v1148_v2 = vadd.f32 %v1147_v0, %v1146_v63 }
 0x128   : > { %1163 = vmatpush3.msra.mxu1 %v1148_v2 }
 0x129   : > { %1164 = vmatprep.subr.mxu1 %v1340_v6 }
 0x12a   : > { %1165 = vmatpush3.msra.mxu1 %v1145_v1 }
 0x1cb   : > { %v766_v52 = vpop.f32.mrf.mxu1 }
 0x1cc   : > { %v770_v53 = vmul.f32 0.125, %v766_v52 }
 0x1cd   : > { %v1161_v54 = vpop.f32.mrf.mxu1 }
 0x1ce   : > { %v772_v55 = vsel %vm771_vm2, %v770_v53, -inf }
 0x1cf   : > { %773 = vmax.xlane.f32.xlu0 %v772_v55 }
 0x258   : > { %v774_v56 = vpop.xlane.xlu0 %773 }
 0x259   : > { %v775_v57 = vsub.f32 %v770_v53, %v774_v56 }
 0x25b   : > { %v776_v58 = vmul.f32 1.442695, %v775_v57 }
 0x25d   : > { %1242 = vpow2.f32 %v776_v58 }
 0x26a   : > { %v1243_v59 = vpop.eup %1242 }
 0x26b   : > { %v778_v60 = vsel %vm771_vm2, %v1243_v59, 0.0 }
 0x26c   : > { %779 = vadd.xlane.f32.xlu0 %v778_v60 }
 0x2f5   : > { %v780_v3 = vpop.xlane.xlu0 %779 }
 0x2f6   : > { %1244 = vrcp.f32 %v780_v3 }
 0x303   : > { %v1245_v4 = vpop.eup %1244 }
 0x304   : > { %v782_v5 = vmul.f32 %v1245_v4, %v1243_v59 }
 0x306   : > { %1167 = vmatmul.mubr.msk.f32.vlgmr.msra.gmra.mxu1 %vm771_vm2, %v782_v5 }
 0x3c6   : > { %v852_v6 = vpop.f32.mrf.mxu1 }
 0x3c7   : > { %856 = vst.msk [vmem:[%s333_s20] sm:$0xff] %vm690_vm1, %v852_v6 }
 0x3c8   : > { %v1168_v7 = vpop.f32.mrf.mxu1 }
 0x3c9   : > { %1259 = shalt.err (!%p1256_p7)
}
 0x3ca   : > { %s1260_s30 = scalar_lea.hbm %s1620_s18, 128  ;;  %s1264_s20 = scalar_lea.hbm %s1679_s6, 1024 }
 0x3cb   : > { %p1261_p9 = scmp.ne.s32.totalorder %s1620_s18, %s1260_s30  ;;  %p1265_p12 = scmp.lt.s32.totalorder %s1620_s18, %s1679_s6 }
 0x3cc   : > { %p1266_p13 = scmp.lt.s32.totalorder %s1264_s20, %s1260_s30 }
 0x3cd   : > { %p1262_p10 = pnand %p1261_p9, %p1429_p3 }
 0x3ce   : > { %p1267_p0 = por %p1266_p13, %p1265_p12 }
 0x3cf   : > { %p1263_p11 = pneg %p1262_p10 }
 0x3d1   : > { %p1268_p1 = pnand %p1267_p0, %p1263_p11 }
 0x3d3   : > { %1271 = shalt.err (!%p1268_p1)
}
 0x3d4   : > { %1169 = dma.vmem_to_hbm [thread:$0]  (%p1429_p3), %s1622_s9, 128, %s1620_s18, %s858_s19  }
 0x3d5 PF: > { %p1175_p2 = scmp.ge.s32.totalorder %s1338_s28, 2  ;;  %s885_s25 = sand.u32 1, %s1310_s21  }
 0x3d6   : > { %s886_s24 = scalar_lea.sflag [#allocation3], %s885_s25 }
 0x3d7   : > { %p1172_p4 = pnand %p1175_p2, %p1438_p8 }
 0x3d9   : > { %p1173_p5 = pneg %p1172_p4 }
 0x3db   : > { %1305 = dma.done.wait (%p1173_p5), %s886_s24, 128  }
 0x3dc   : > { %1307 = vsyncadd (%p1173_p5), %s886_s24, 4294967168  ;;  %s19_s28 = sadd.s32 1, %s1338_s28   ;;  %s1682_s21 = smov %s1314_s22 }
 0x3dd   : > { %p16_p6 = scmp.ge.s32.totalorder %s19_s28, 10   ;;  %s1683_s22 = smov %s1318_s23 }
 0x3de   : > { %s1684_s23 = smov %s1447_s15  ;;  %s1685_s24 = smov %s1330_s26 }
 0x3df   : > { %s1686_s25 = smov %s1334_s27  ;;  %s1687_s26 = smov %s1690_s7 }
 0x3e0   : > { %s1688_s27 = smov %s1694_s8  ;;  %18 = sbr.rel (!%p16_p6) target bundleno = 5 (0x5), region = 94 }
 0x3e5   :  { %891 = vsyncpa [#allocation3], 1 }
 0x3e6   :  { %893 = vsyncpa [#allocation3 + $0x1], 1 }

</bundles_post_ra>
